<compile_context>
chip_gen: v7x
topology: tpu7x:2x2x1
jax: 0.10.0
libtpu: 0.0.40
codegen_flags: <defaults>
</compile_context>

<pallas_src>
import functools

import jax
import jax.numpy as jnp
from jax.experimental import pallas as pl
from jax.experimental.pallas import tpu as pltpu


# ---------------------------------------------------------------------------
# Pallas kernels
# ---------------------------------------------------------------------------
def _leaky(x):
    return jnp.where(x > 0, x, 0.2 * x)


def _conv_leaky_kernel(a_ref, b_ref, bias_ref, o_ref):
    # bf16 x bf16 -> f32 accumulate on the MXU; f32 epilogue.
    acc = jnp.dot(a_ref[...], b_ref[...], preferred_element_type=jnp.float32)
    acc = acc + bias_ref[...]
    o_ref[...] = _leaky(acc).astype(o_ref.dtype)


def conv_leaky_matmul(a, b, bias, tm=256):
    """a: [M, K] bf16, b: [K, N] bf16, bias: [1, N] f32 -> [M, N] bf16."""
    M, K = a.shape
    _, N = b.shape
    if M % tm != 0:
        tm = M
    return pl.pallas_call(
        _conv_leaky_kernel,
        out_shape=jax.ShapeDtypeStruct((M, N), jnp.bfloat16),
        grid=(M // tm,),
        in_specs=[
            pl.BlockSpec((tm, K), lambda i: (i, 0)),
            pl.BlockSpec((K, N), lambda i: (0, 0)),
            pl.BlockSpec((1, N), lambda i: (0, 0)),
        ],
        out_specs=pl.BlockSpec((tm, N), lambda i: (i, 0)),
        compiler_params=pltpu.CompilerParams(dimension_semantics=("parallel",)),
    )(a, b, bias)


def _conv_bn_leaky_kernel(a_ref, b_ref, bias_ref, gamma_ref, beta_ref, o_ref, *, eps):
    acc = jnp.dot(a_ref[...], b_ref[...], preferred_element_type=jnp.float32)
    acc = acc + bias_ref[...]                              # [M, C] f32 pre-activation
    # BatchNorm2d (training-mode batch stats): M = B*H*W so axis-0 stats are the
    # per-channel batch mean / biased variance.
    mean = jnp.mean(acc, axis=0, keepdims=True)            # [1, C]
    xc = acc - mean
    var = jnp.mean(xc * xc, axis=0, keepdims=True)         # biased, like PyTorch
    scale = gamma_ref[...] * jax.lax.rsqrt(var + eps)
    y = xc * scale + beta_ref[...]
    o_ref[...] = _leaky(y).astype(o_ref.dtype)


def conv_bn_leaky_matmul(a, b, bias, gamma, beta, eps=1e-5):
    """Fused conv-as-matmul + bias + BatchNorm(batch stats) + LeakyReLU(0.2)."""
    M, K = a.shape
    _, N = b.shape
    kernel = functools.partial(_conv_bn_leaky_kernel, eps=eps)
    return pl.pallas_call(
        kernel,
        out_shape=jax.ShapeDtypeStruct((M, N), jnp.bfloat16),
        grid=(1,),
        in_specs=[
            pl.BlockSpec((M, K), lambda i: (0, 0)),
            pl.BlockSpec((K, N), lambda i: (0, 0)),
            pl.BlockSpec((1, N), lambda i: (0, 0)),
            pl.BlockSpec((1, N), lambda i: (0, 0)),
            pl.BlockSpec((1, N), lambda i: (0, 0)),
        ],
        out_specs=pl.BlockSpec((M, N), lambda i: (0, 0)),
        compiler_params=pltpu.CompilerParams(dimension_semantics=("arbitrary",)),
    )(a, b, bias, gamma, beta)


def _conv_bn_leaky_fc_sigmoid_kernel(a_ref, b_ref, bias_ref, gamma_ref, beta_ref,
                                     wfc_ref, bfc_ref, o_ref, *, eps, batch, hw):
    acc = jnp.dot(a_ref[...], b_ref[...], preferred_element_type=jnp.float32)
    acc = acc + bias_ref[...]                              # [B*HW, C] f32
    mean = jnp.mean(acc, axis=0, keepdims=True)
    xc = acc - mean
    var = jnp.mean(xc * xc, axis=0, keepdims=True)
    scale = gamma_ref[...] * jax.lax.rsqrt(var + eps)
    y = _leaky(xc * scale + beta_ref[...])                 # [B*HW, C] f32
    # Fused Linear(256*8*8 -> 1): wfc_ref is the FC weight pre-permuted /
    # pre-tiled at trace time to [B*HW, C] matching y's row ordering, so the FC
    # is a VPU multiply + per-batch reduction (no N=1 MXU pass, no flatten).
    prod = y * wfc_ref[...]
    prod3 = prod.reshape(batch, hw, prod.shape[-1])        # layout-preserving split
    per_hw = jnp.sum(prod3, axis=2)                        # [B, HW]
    fc = jnp.sum(per_hw, axis=1, keepdims=True) + bfc_ref[...]   # [B, 1]
    sig = pl.reciprocal(1.0 + jnp.exp(-fc), approx=False)  # exact -> stays in [0,1]
    o_ref[...] = sig.astype(o_ref.dtype)


def conv_bn_leaky_fc_sigmoid(a, b, bias, gamma, beta, wfc_tiled, bfc, batch, eps=1e-5):
    M, K = a.shape
    _, N = b.shape
    hw = M // batch
    kernel = functools.partial(_conv_bn_leaky_fc_sigmoid_kernel,
                               eps=eps, batch=batch, hw=hw)
    return pl.pallas_call(
        kernel,
        out_shape=jax.ShapeDtypeStruct((batch, 1), jnp.float32),
        grid=(1,),
        in_specs=[
            pl.BlockSpec((M, K), lambda i: (0, 0)),
            pl.BlockSpec((K, N), lambda i: (0, 0)),
            pl.BlockSpec((1, N), lambda i: (0, 0)),
            pl.BlockSpec((1, N), lambda i: (0, 0)),
            pl.BlockSpec((1, N), lambda i: (0, 0)),
            pl.BlockSpec((M, N), lambda i: (0, 0)),
            pl.BlockSpec((1, 1), lambda i: (0, 0)),
        ],
        out_specs=pl.BlockSpec((batch, 1), lambda i: (0, 0)),
        compiler_params=pltpu.CompilerParams(dimension_semantics=("arbitrary",)),
    )(a, b, bias, gamma, beta, wfc_tiled, bfc)


# ---------------------------------------------------------------------------
# Trace-time glue (bf16 im2col + weight layout prep)
# ---------------------------------------------------------------------------
def im2col(x_nhwc, kh=4, kw=4, stride=2, pad=1):
    """[N,H,W,Cin] -> ([N*Ho*Wo, kh*kw*Cin], Ho, Wo), patch cols ordered (ki,kj,cin)."""
    N, H, W, Cin = x_nhwc.shape
    Ho = (H + 2 * pad - kh) // stride + 1
    Wo = (W + 2 * pad - kw) // stride + 1
    xp = jnp.pad(x_nhwc, ((0, 0), (pad, pad), (pad, pad), (0, 0)))
    cols = []
    for ki in range(kh):
        for kj in range(kw):
            cols.append(xp[:, ki:ki + stride * Ho:stride,
                           kj:kj + stride * Wo:stride, :])
    patches = jnp.concatenate(cols, axis=-1).reshape(N * Ho * Wo, kh * kw * Cin)
    return patches, Ho, Wo


def conv_weight_matrix(w_oihw):
    """[Cout,Cin,kh,kw] -> [kh*kw*Cin, Cout] bf16, rows ordered (ki,kj,cin)."""
    Cout, Cin, kh, kw = w_oihw.shape
    return jnp.transpose(w_oihw, (2, 3, 1, 0)).reshape(kh * kw * Cin, Cout) \
              .astype(jnp.bfloat16)


def discriminator_forward(x_nchw, params):
    B = x_nchw.shape[0]
    x = jnp.transpose(x_nchw, (0, 2, 3, 1)).astype(jnp.bfloat16)       # NHWC bf16

    # Conv(1->64, k4 s2 p1) + LeakyReLU(0.2)
    p1, H1, W1 = im2col(x)                                             # [B*32*32, 16]
    a1 = conv_leaky_matmul(p1, conv_weight_matrix(params["w1"]),
                           params["b1"].reshape(1, -1))
    x1 = a1.reshape(B, H1, W1, 64)

    # Conv(64->128) + BatchNorm(128) + LeakyReLU(0.2)  — single fused kernel
    p2, H2, W2 = im2col(x1)                                            # [B*16*16, 1024]
    a2 = conv_bn_leaky_matmul(p2, conv_weight_matrix(params["w2"]),
                              params["b2"].reshape(1, -1),
                              params["g2"].reshape(1, -1),
                              params["be2"].reshape(1, -1))
    x2 = a2.reshape(B, H2, W2, 128)

    # Conv(128->256) + BN(256) + LeakyReLU + Flatten + Linear + Sigmoid — fused
    p3, H3, W3 = im2col(x2)                                            # [B*8*8, 2048]
    hw = H3 * W3
    # Fold PyTorch's NCHW flatten order into the FC weight at trace time:
    # wfc [1, C*H*W] (c,h,w) -> [H*W, C] with row = h*W+w, col = c, then tile over B
    # so it aligns elementwise with the kernel's [B*H*W, C] activation.
    wfc_mat = jnp.transpose(params["wfc"].reshape(256, H3, W3), (1, 2, 0)) \
                 .reshape(hw, 256)
    wfc_tiled = jnp.tile(wfc_mat, (B, 1)).astype(jnp.float32)          # [B*HW, 256]
    out = conv_bn_leaky_fc_sigmoid(
        p3, conv_weight_matrix(params["w3"]),
        params["b3"].reshape(1, -1), params["g3"].reshape(1, -1),
        params["be3"].reshape(1, -1),
        wfc_tiled, params["bfc"].reshape(1, 1), batch=B)
    return out                                                         # [B, 1]


# ---------------------------------------------------------------------------
# Deterministic parameter init + driver
# ---------------------------------------------------------------------------
def init_params(key):
    ks = jax.random.split(key, 8)
    return {
        "w1": jax.random.normal(ks[0], (64, 1, 4, 4), jnp.float32) * 0.05,
        "b1": jax.random.normal(ks[1], (64,), jnp.float32) * 0.05,
        "w2": jax.random.normal(ks[2], (128, 64, 4, 4), jnp.float32) * 0.05,
        "b2": jax.random.normal(ks[3], (128,), jnp.float32) * 0.05,
        "w3": jax.random.normal(ks[4], (256, 128, 4, 4), jnp.float32) * 0.05,
        "b3": jax.random.normal(ks[5], (256,), jnp.float32) * 0.05,
        # BatchNorm default init: weight=1, bias=0 (PyTorch default)
        "g2": jnp.ones((128,), jnp.float32),
        "be2": jnp.zeros((128,), jnp.float32),
        "g3": jnp.ones((256,), jnp.float32),
        "be3": jnp.zeros((256,), jnp.float32),
        "wfc": jax.random.normal(ks[6], (1, 256 * 8 * 8), jnp.float32) * 0.01,
        "bfc": jax.random.normal(ks[7], (1,), jnp.float32) * 0.01,
    }


if __name__ == "__main__":
    key = jax.random.PRNGKey(0)
    kx, kp = jax.random.split(key)
    # Input: batch=2, 1 channel, 64x64 (required by the 256*8*8 Linear layer).
    x = jax.random.normal(kx, (2, 1, 64, 64), jnp.float32)
    params = init_params(kp)

    out = discriminator_forward(x, params)
    out = jax.block_until_ready(out)

    assert out.shape == (2, 1), out.shape
    assert bool(jnp.all(jnp.isfinite(out)))
    assert bool(jnp.all((out >= 0.0) & (out <= 1.0)))
    print("KERNEL_OK")
</pallas_src>

<mosaic_0001>
module attributes {stable_mosaic.version = 11 : i64} {
  func.func @_conv_leaky_kernel(%arg0: i32, %arg1: memref<256x16xbf16, #tpu.memory_space<vmem>>, %arg2: memref<16x64xbf16, #tpu.memory_space<vmem>>, %arg3: memref<1x64xf32, #tpu.memory_space<vmem>>, %arg4: memref<256x64xbf16, #tpu.memory_space<vmem>>) attributes {dimension_semantics = [#tpu.dimension_semantics<parallel>], iteration_bounds = array<i64: 8>, scalar_prefetch = 0 : i64, scratch_operands = 0 : i64, tpu.core_type = #tpu.core_type<tc>, window_params = [{transform_indices = @transform_0, window_bounds = array<i64: 256, 16>}, {pipeline_mode = #tpu.pipeline_mode<synchronous>, transform_indices = @transform_1, window_bounds = array<i64: 16, 64>}, {pipeline_mode = #tpu.pipeline_mode<synchronous>, transform_indices = @transform_2, window_bounds = array<i64: 1, 64>}, {transform_indices = @transform_3, window_bounds = array<i64: 256, 64>}]} {
    %c0 = arith.constant 0 : index
    %c0_0 = arith.constant 0 : index
    %0 = vector.load %arg1[%c0, %c0_0] : memref<256x16xbf16, #tpu.memory_space<vmem>>, vector<256x16xbf16>
    %c0_1 = arith.constant 0 : index
    %c0_2 = arith.constant 0 : index
    %1 = vector.load %arg2[%c0_1, %c0_2] : memref<16x64xbf16, #tpu.memory_space<vmem>>, vector<16x64xbf16>
    %cst = arith.constant dense<0.000000e+00> : vector<256x64xf32>
    %2 = tpu.matmul %0, %1, %cst {dimension_numbers = #tpu.dot_dimension_numbers<[1], [0], [0], [1], [0, 0, 1, 1], [], []>} : vector<256x16xbf16>, vector<16x64xbf16>, vector<256x64xf32> -> vector<256x64xf32>
    %c0_3 = arith.constant 0 : index
    %c0_4 = arith.constant 0 : index
    %3 = vector.load %arg3[%c0_3, %c0_4] : memref<1x64xf32, #tpu.memory_space<vmem>>, vector<1x64xf32>
    %4 = vector.broadcast %3 : vector<1x64xf32> to vector<256x64xf32>
    %5 = arith.addf %2, %4 : vector<256x64xf32>
    %cst_5 = arith.constant 0.000000e+00 : f32
    %6 = vector.broadcast %cst_5 : f32 to vector<256x64xf32>
    %7 = arith.cmpf ogt, %5, %6 : vector<256x64xf32>
    %cst_6 = arith.constant 2.000000e-01 : f32
    %8 = vector.broadcast %cst_6 : f32 to vector<256x64xf32>
    %9 = arith.mulf %8, %5 : vector<256x64xf32>
    %10 = arith.select %7, %5, %9 : vector<256x64xi1>, vector<256x64xf32>
    %11 = arith.truncf %10 : vector<256x64xf32> to vector<256x64xbf16>
    %c0_7 = arith.constant 0 : index
    %c0_8 = arith.constant 0 : index
    %12 = vector.load %arg4[%c0_7, %c0_8] : memref<256x64xbf16, #tpu.memory_space<vmem>>, vector<256x64xbf16>
    tpu.vector_store %arg4[%c0_7, %c0_8], %11 {strides = array<i32>} : memref<256x64xbf16, #tpu.memory_space<vmem>>, vector<256x64xbf16>,
    return
  }
  func.func @transform_0(%arg0: i32) -> (i32, i32) {
    %c0_i32 = arith.constant 0 : i32
    %c0_i32_0 = arith.constant 0 : i32
    return %arg0, %c0_i32 : i32, i32
  }
  func.func @transform_1(%arg0: i32) -> (i32, i32) {
    %c0_i32 = arith.constant 0 : i32
    %c0_i32_0 = arith.constant 0 : i32
    %c0_i32_1 = arith.constant 0 : i32
    return %c0_i32, %c0_i32_0 : i32, i32
  }
  func.func @transform_2(%arg0: i32) -> (i32, i32) {
    %c0_i32 = arith.constant 0 : i32
    %c0_i32_0 = arith.constant 0 : i32
    %c0_i32_1 = arith.constant 0 : i32
    return %c0_i32, %c0_i32_0 : i32, i32
  }
  func.func @transform_3(%arg0: i32) -> (i32, i32) {
    %c0_i32 = arith.constant 0 : i32
    %c0_i32_0 = arith.constant 0 : i32
    return %arg0, %c0_i32 : i32, i32
  }
}

</mosaic_0001>

<bundles_post_ra>
// kernel: tpu_custom_call.1
= control target key start
LH: loop header
LB: loop body
LE: loop exit
PB: predicated region body
PF: predicated region fallthrough
CT: control target
= control target key end

     0   :  { %s1040_s12 = smov 0   ;;  %s1206_s0 = inlined_call_operand.vmem [shape: bf16[2048,16], index: 0, kind: input, shape index: {}]   ;;  %s1207_s1 = inlined_call_operand.vmem [shape: bf16[16,64], index: 1, kind: input, shape index: {}]   ;;  %s1208_s2 = inlined_call_operand.vmem [shape: f32[1,64], index: 2, kind: input, shape index: {}]   ;;  %s1209_s3 = inlined_call_operand.vmem [shape: bf16[2048,64], index: 3, kind: output, shape index: {}]  }
   0x1 LB: > { %s825_s13 = sadd.s32 4294967295, %s1018_s12   ;;  %p829_p0 = scmp.ge.s32.totalorder %s1018_s12, 1  ;;  %s1018_s12 = sphi %s1040_s12, %s13_s12  }
   0x2   : > { %p138_p1 = scmp.lt.s32.totalorder %s1018_s12, 9 }
   0x4   : > { %p139_p2 = pnand %p829_p0, %p138_p1 }
   0x5   : > { %v995_v0 = vld [vmem:[%s1207_s1] sm:$0xff] (!%p139_p2)   ;;  %s830_s16 = sshll.u32 (!%p139_p2), %s825_s13, 5  ;;  %vm302_vm0 = vcmask (!%p139_p2), 130048   ;;  %vm736_vm1 = vcmask (!%p139_p2), 519168  }
   0x6   : > { %142 = sbr.rel (%p139_p2) target bundleno = 276 (0x114), region = 32  ;;  %p163_p3 = scmp.lt.s32.totalorder (!%p139_p2), %s830_s16, 255  ;;  %951 = vmatprep.subr.bf16.mxu0 (!%p139_p2), %v995_v0  ;;  %985 = vmatprep.subr.bf16.mxu1 (!%p139_p2), %v995_v0  ;;  %v1096_v17 = vld [vmem:[%s1208_s2] ss:$0 sm:$0xff] (!%p139_p2) }
   0x7   : > { %952 = vmatpush3.bf16.msra.mxu0 (!%p139_p2), %v995_v0  ;;  %986 = vmatpush3.bf16.msra.mxu1 (!%p139_p2), %v995_v0 }
   0xd   : > { %s1211_s16 = smov (!%p163_p3, %s830_s16), 255 }
   0xe   : > { %s831_s17 = sshll.u32 %s1211_s16, 2 }
   0xf   : > { %s1059_s20 = scalar_lea.vmem %s1206_s0, %s831_s17  ;;  %s1108_s25 = scalar_lea.vmem %s1209_s3, %s831_s17 }
  0x10   : > { %v996_v1 = vld [vmem:[%s1059_s20] sm:$0xff]   ;;  %v998_v3 = vld [vmem:[%s1059_s20 + $0x8] sm:$0xff]   ;;  %v1000_v5 = vld [vmem:[%s1059_s20 + $0x10] sm:$0xff]  }
  0x11   : > { %v997_v2 = vld [vmem:[%s1059_s20 + $0x40] sm:$0xff]   ;;  %953 = vmatprep.mubr.msk.bf16.mxu0 %vm302_vm0, %v996_v1  ;;  %v999_v4 = vld [vmem:[%s1059_s20 + $0x48] sm:$0xff]   ;;  %v1001_v6 = vld [vmem:[%s1059_s20 + $0x50] sm:$0xff]  }
  0x12   : > { %969 = vmatprep.mubr.msk.bf16.mxu1 %vm302_vm0, %v997_v2  ;;  %954 = vmatmul.mubr.msk.bf16.vlgmr.msra.gmra.mrb[0].mxu0 %vm302_vm0, %v998_v3  ;;  %v1002_v7 = vld [vmem:[%s1059_s20 + $0x18] sm:$0xff]   ;;  %v1004_v9 = vld [vmem:[%s1059_s20 + $0x20] sm:$0xff]   ;;  %v1006_v11 = vld [vmem:[%s1059_s20 + $0x28] sm:$0xff]  }
  0x13   : > { %970 = vmatmul.mubr.msk.bf16.vlgmr.msra.gmra.mrb[0].mxu1 %vm302_vm0, %v999_v4  ;;  %957 = vmatprep.mubr.msk.bf16.mxu0 %vm302_vm0, %v1000_v5  ;;  %v1003_v8 = vld [vmem:[%s1059_s20 + $0x58] sm:$0xff]   ;;  %v1005_v10 = vld [vmem:[%s1059_s20 + $0x60] sm:$0xff]   ;;  %v1007_v12 = vld [vmem:[%s1059_s20 + $0x68] sm:$0xff]  }
  0x14   : > { %973 = vmatprep.mubr.msk.bf16.mxu1 %vm302_vm0, %v1001_v6  ;;  %v1008_v13 = vld [vmem:[%s1059_s20 + $0x30] sm:$0xff]   ;;  %v1010_v15 = vld [vmem:[%s1059_s20 + $0x38] sm:$0xff]  }
  0x15   : > { %v1009_v14 = vld [vmem:[%s1059_s20 + $0x70] sm:$0xff]   ;;  %v1011_v16 = vld [vmem:[%s1059_s20 + $0x78] sm:$0xff]  }
  0x1a   : > { %958 = vmatmul.mubr.msk.bf16.gmra.mrb[4].mxu0 %vm302_vm0, %v1002_v7 }
  0x1b   : > { %974 = vmatmul.mubr.msk.bf16.gmra.mrb[4].mxu1 %vm302_vm0, %v1003_v8  ;;  %961 = vmatprep.mubr.msk.bf16.mxu0 %vm302_vm0, %v1004_v9 }
  0x1c   : > { %977 = vmatprep.mubr.msk.bf16.mxu1 %vm302_vm0, %v1005_v10 }
  0x22   : > { %962 = vmatmul.mubr.msk.bf16.gmra.mrb[8].mxu0 %vm302_vm0, %v1006_v11 }
  0x23   : > { %978 = vmatmul.mubr.msk.bf16.gmra.mrb[8].mxu1 %vm302_vm0, %v1007_v12  ;;  %965 = vmatprep.mubr.msk.bf16.mxu0 %vm302_vm0, %v1008_v13 }
  0x24   : > { %981 = vmatprep.mubr.msk.bf16.mxu1 %vm302_vm0, %v1009_v14 }
  0x2a   : > { %966 = vmatmul.mubr.msk.bf16.gmra.mrb[12].mxu0 %vm302_vm0, %v1010_v15 }
  0x2b   : > { %982 = vmatmul.mubr.msk.bf16.gmra.mrb[12].mxu1 %vm302_vm0, %v1011_v16 }
  0xe5   : > { %v955_v18 = vpop.f32.mrb[0].mxu0 }
  0xe6   : > { %v394_v19 = vadd.f32 %v955_v18, %v1096_v17  ;;  %v971_v20 = vpop.f32.mrb[0].mxu1  ;;  %v385_v21 = vpop.f32.mrb[1].mxu0 }
  0xe7   : > { %v458_v22 = vadd.f32 %v971_v20, %v1096_v17  ;;  %v386_v23 = vadd.f32 %v1096_v17, %v385_v21  ;;  %v449_v24 = vpop.f32.mrb[1].mxu1  ;;  %v956_v25 = vpop.f32.mrb[2].mxu0 }
  0xe8   : > { %vm514_vm2 = vcmp.gt.f32.partialorder %v394_v19, 0.0  ;;  %v546_v26 = vmul.f32 0.2, %v394_v19  ;;  %v450_v27 = vadd.f32 %v1096_v17, %v449_v24  ;;  %v397_v28 = vadd.f32 %v956_v25, %v1096_v17  ;;  %v972_v29 = vpop.f32.mrb[2].mxu1  ;;  %v388_v30 = vpop.f32.mrb[3].mxu0 }
  0xe9   : > { %vm530_vm3 = vcmp.gt.f32.partialorder %v458_v22, 0.0  ;;  %v562_v31 = vmul.f32 0.2, %v458_v22  ;;  %vm512_vm4 = vcmp.gt.f32.partialorder %v386_v23, 0.0  ;;  %v544_v32 = vmul.f32 0.2, %v386_v23 }
  0xea   : > { %v578_v33 = vsel %vm514_vm2, %v394_v19, %v546_v26  ;;  %vm528_vm5 = vcmp.gt.f32.partialorder %v450_v27, 0.0  ;;  %v560_v34 = vmul.f32 0.2, %v450_v27  ;;  %vm515_vm6 = vcmp.gt.f32.partialorder %v397_v28, 0.0  ;;  %v452_v35 = vpop.f32.mrb[3].mxu1 }
  0xeb   : > { %v904_v36 = vpack.c.bf16 %v578_v33, %v578_v33  ;;  %v594_v37 = vsel %vm530_vm3, %v458_v22, %v562_v31  ;;  %v576_v38 = vsel %vm512_vm4, %v386_v23, %v544_v32  ;;  %v547_v39 = vmul.f32 0.2, %v397_v28 }
  0xec   : > { %v920_v40 = vpack.c.bf16 %v594_v37, %v594_v37  ;;  %v902_v41 = vpack.c.bf16 %v576_v38, %v576_v38  ;;  %v592_v42 = vsel %vm528_vm5, %v450_v27, %v560_v34  ;;  %v461_v43 = vadd.f32 %v972_v29, %v1096_v17 }
  0xed   : > { %739 = vst.msk [vmem:[%s1108_s25 + $0x8] sm:$0xf] %vm736_vm1, %v904_v36  ;;  %v918_v44 = vpack.c.bf16 %v592_v42, %v592_v42  ;;  %v579_v45 = vsel %vm515_vm6, %v397_v28, %v547_v39  ;;  %v389_v46 = vadd.f32 %v1096_v17, %v388_v30  ;;  %v453_v47 = vadd.f32 %v1096_v17, %v452_v35  ;;  %v959_v48 = vpop.f32.mrb[4].mxu0 }
  0xee   : > { %755 = vst.msk [vmem:[%s1108_s25 + $0x48] sm:$0xf] %vm736_vm1, %v920_v40  ;;  %737 = vst.msk [vmem:[%s1108_s25] sm:$0xf] %vm736_vm1, %v902_v41  ;;  %v905_v49 = vpack.c.bf16 %v579_v45, %v579_v45  ;;  %vm531_vm7 = vcmp.gt.f32.partialorder %v461_v43, 0.0  ;;  %v410_v51 = vadd.f32 %v959_v48, %v1096_v17  ;;  %v975_v52 = vpop.f32.mrb[4].mxu1 }
  0xef   : > { %v563_v50 = vmul.f32 0.2, %v461_v43  ;;  %v401_v53 = vpop.f32.mrb[5].mxu0  ;;  %753 = vst.msk [vmem:[%s1108_s25 + $0x40] sm:$0xf] %vm736_vm1, %v918_v44  ;;  %vm513_vm8 = vcmp.gt.f32.partialorder %v389_v46, 0.0  ;;  %v474_v58 = vadd.f32 %v975_v52, %v1096_v17 }
  0xf0   : > { %v545_v54 = vmul.f32 0.2, %v389_v46  ;;  %vm529_vm9 = vcmp.gt.f32.partialorder %v453_v47, 0.0  ;;  %v561_v55 = vmul.f32 0.2, %v453_v47  ;;  %vm518_vm10 = vcmp.gt.f32.partialorder %v410_v51, 0.0 }
  0xf1   : > { %740 = vst.msk [vmem:[%s1108_s25 + $0xc] sm:$0xf] %vm736_vm1, %v905_v49  ;;  %v595_v56 = vsel %vm531_vm7, %v461_v43, %v563_v50  ;;  %v550_v57 = vmul.f32 0.2, %v410_v51  ;;  %v465_v59 = vpop.f32.mrb[5].mxu1  ;;  %v960_v60 = vpop.f32.mrb[6].mxu0  ;;  %v402_v0 = vadd.f32 %v1096_v17, %v401_v53 }
  0xf2   : > { %v921_v61 = vpack.c.bf16 %v595_v56, %v595_v56  ;;  %v577_v62 = vsel %vm513_vm8, %v389_v46, %v545_v54  ;;  %v593_v63 = vsel %vm529_vm9, %v453_v47, %v561_v55  ;;  %v976_v1 = vpop.f32.mrb[6].mxu1  ;;  %v404_v2 = vpop.f32.mrb[7].mxu0  ;;  %vm534_vm11 = vcmp.gt.f32.partialorder %v474_v58, 0.0 }
  0xf3   : > { %v903_v3 = vpack.c.bf16 %v577_v62, %v577_v62  ;;  %v919_v4 = vpack.c.bf16 %v593_v63, %v593_v63  ;;  %v582_v5 = vsel %vm518_vm10, %v410_v51, %v550_v57  ;;  %v468_v6 = vpop.f32.mrb[7].mxu1  ;;  %v566_v8 = vmul.f32 0.2, %v474_v58 }
  0xf4   : > { %756 = vst.msk [vmem:[%s1108_s25 + $0x4c] sm:$0xf] %vm736_vm1, %v921_v61  ;;  %v908_v7 = vpack.c.bf16 %v582_v5, %v582_v5  ;;  %vm516_vm12 = vcmp.gt.f32.partialorder %v402_v0, 0.0  ;;  %v548_v9 = vmul.f32 0.2, %v402_v0  ;;  %v466_v10 = vadd.f32 %v1096_v17, %v465_v59 }
  0xf5   : > { %738 = vst.msk [vmem:[%s1108_s25 + $0x4] sm:$0xf] %vm736_vm1, %v903_v3  ;;  %754 = vst.msk [vmem:[%s1108_s25 + $0x44] sm:$0xf] %vm736_vm1, %v919_v4  ;;  %v413_v11 = vadd.f32 %v960_v60, %v1096_v17  ;;  %v477_v12 = vadd.f32 %v976_v1, %v1096_v17  ;;  %v405_v13 = vadd.f32 %v1096_v17, %v404_v2  ;;  %v963_v18 = vpop.f32.mrb[8].mxu0 }
  0xf6   : > { %743 = vst.msk [vmem:[%s1108_s25 + $0x18] sm:$0xf] %vm736_vm1, %v908_v7  ;;  %v598_v14 = vsel %vm534_vm11, %v474_v58, %v566_v8  ;;  %v580_v15 = vsel %vm516_vm12, %v402_v0, %v548_v9  ;;  %v469_v16 = vadd.f32 %v1096_v17, %v468_v6  ;;  %vm532_vm13 = vcmp.gt.f32.partialorder %v466_v10, 0.0  ;;  %v979_v22 = vpop.f32.mrb[8].mxu1  ;;  %v417_v23 = vpop.f32.mrb[9].mxu0 }
  0xf7   : > { %v924_v19 = vpack.c.bf16 %v598_v14, %v598_v14  ;;  %v906_v20 = vpack.c.bf16 %v580_v15, %v580_v15  ;;  %v564_v21 = vmul.f32 0.2, %v466_v10  ;;  %vm519_vm14 = vcmp.gt.f32.partialorder %v413_v11, 0.0  ;;  %v481_v28 = vpop.f32.mrb[9].mxu1  ;;  %v964_v29 = vpop.f32.mrb[10].mxu0 }
  0xf8   : > { %v551_v24 = vmul.f32 0.2, %v413_v11  ;;  %vm535_vm15 = vcmp.gt.f32.partialorder %v477_v12, 0.0  ;;  %v567_v25 = vmul.f32 0.2, %v477_v12  ;;  %vm517_vm0 = vcmp.gt.f32.partialorder %v405_v13, 0.0 }
  0xf9   : > { %759 = vst.msk [vmem:[%s1108_s25 + $0x58] sm:$0xf] %vm736_vm1, %v924_v19  ;;  %741 = vst.msk [vmem:[%s1108_s25 + $0x10] sm:$0xf] %vm736_vm1, %v906_v20  ;;  %v596_v26 = vsel %vm532_vm13, %v466_v10, %v564_v21  ;;  %v549_v27 = vmul.f32 0.2, %v405_v13  ;;  %v426_v39 = vadd.f32 %v963_v18, %v1096_v17  ;;  %v490_v43 = vadd.f32 %v979_v22, %v1096_v17 }
  0xfa   : > { %vm533_vm2 = vcmp.gt.f32.partialorder %v469_v16, 0.0  ;;  %v922_v30 = vpack.c.bf16 %v596_v26, %v596_v26  ;;  %v583_v31 = vsel %vm519_vm14, %v413_v11, %v551_v24  ;;  %v599_v32 = vsel %vm535_vm15, %v477_v12, %v567_v25  ;;  %v980_v34 = vpop.f32.mrb[10].mxu1  ;;  %v420_v35 = vpop.f32.mrb[11].mxu0 }
  0xfb   : > { %v565_v33 = vmul.f32 0.2, %v469_v16  ;;  %v909_v36 = vpack.c.bf16 %v583_v31, %v583_v31  ;;  %v925_v37 = vpack.c.bf16 %v599_v32, %v599_v32  ;;  %v581_v38 = vsel %vm517_vm0, %v405_v13, %v549_v27  ;;  %v484_v40 = vpop.f32.mrb[11].mxu1 }
  0xfc   : > { %757 = vst.msk [vmem:[%s1108_s25 + $0x50] sm:$0xf] %vm736_vm1, %v922_v30  ;;  %v907_v41 = vpack.c.bf16 %v581_v38, %v581_v38  ;;  %v418_v44 = vadd.f32 %v1096_v17, %v417_v23  ;;  %vm522_vm3 = vcmp.gt.f32.partialorder %v426_v39, 0.0  ;;  %v554_v46 = vmul.f32 0.2, %v426_v39 }
  0xfd   : > { %v597_v42 = vsel %vm533_vm2, %v469_v16, %v565_v33  ;;  %744 = vst.msk [vmem:[%s1108_s25 + $0x1c] sm:$0xf] %vm736_vm1, %v909_v36  ;;  %760 = vst.msk [vmem:[%s1108_s25 + $0x5c] sm:$0xf] %vm736_vm1, %v925_v37  ;;  %v482_v47 = vadd.f32 %v1096_v17, %v481_v28  ;;  %vm538_vm4 = vcmp.gt.f32.partialorder %v490_v43, 0.0  ;;  %v429_v52 = vadd.f32 %v964_v29, %v1096_v17  ;;  %v967_v53 = vpop.f32.mrb[12].mxu0 }
  0xfe   : > { %v923_v45 = vpack.c.bf16 %v597_v42, %v597_v42  ;;  %742 = vst.msk [vmem:[%s1108_s25 + $0x14] sm:$0xf] %vm736_vm1, %v907_v41  ;;  %v570_v48 = vmul.f32 0.2, %v490_v43  ;;  %vm520_vm5 = vcmp.gt.f32.partialorder %v418_v44, 0.0  ;;  %v586_v50 = vsel %vm522_vm3, %v426_v39, %v554_v46  ;;  %v983_v54 = vpop.f32.mrb[12].mxu1 }
  0xff   : > { %v552_v49 = vmul.f32 0.2, %v418_v44  ;;  %vm536_vm6 = vcmp.gt.f32.partialorder %v482_v47, 0.0  ;;  %v568_v51 = vmul.f32 0.2, %v482_v47  ;;  %v912_v55 = vpack.c.bf16 %v586_v50, %v586_v50  ;;  %v433_v59 = vpop.f32.mrb[13].mxu0 }
 0x100   : > { %758 = vst.msk [vmem:[%s1108_s25 + $0x54] sm:$0xf] %vm736_vm1, %v923_v45  ;;  %v602_v56 = vsel %vm538_vm4, %v490_v43, %v570_v48  ;;  %v493_v58 = vadd.f32 %v980_v34, %v1096_v17  ;;  %v497_v60 = vpop.f32.mrb[13].mxu1  ;;  %vm523_vm7 = vcmp.gt.f32.partialorder %v429_v52, 0.0  ;;  %v968_v0 = vpop.f32.mrb[14].mxu0  ;;  %v421_v6 = vadd.f32 %v1096_v17, %v420_v35 }
 0x101   : > { %v584_v57 = vsel %vm520_vm5, %v418_v44, %v552_v49  ;;  %v928_v61 = vpack.c.bf16 %v602_v56, %v602_v56  ;;  %v600_v63 = vsel %vm536_vm6, %v482_v47, %v568_v51  ;;  %v984_v1 = vpop.f32.mrb[14].mxu1  ;;  %747 = vst.msk [vmem:[%s1108_s25 + $0x28] sm:$0xf] %vm736_vm1, %v912_v55  ;;  %v555_v3 = vmul.f32 0.2, %v429_v52  ;;  %v436_v5 = vpop.f32.mrb[15].mxu0 }
 0x102   : > { %v910_v62 = vpack.c.bf16 %v584_v57, %v584_v57  ;;  %v926_v2 = vpack.c.bf16 %v600_v63, %v600_v63  ;;  %vm539_vm8 = vcmp.gt.f32.partialorder %v493_v58, 0.0  ;;  %v571_v4 = vmul.f32 0.2, %v493_v58  ;;  %v500_v10 = vpop.f32.mrb[15].mxu1 }
 0x103   : > { %763 = vst.msk [vmem:[%s1108_s25 + $0x68] sm:$0xf] %vm736_vm1, %v928_v61  ;;  %v485_v7 = vadd.f32 %v1096_v17, %v484_v40  ;;  %v442_v8 = vadd.f32 %v967_v53, %v1096_v17  ;;  %v506_v9 = vadd.f32 %v983_v54, %v1096_v17  ;;  %v587_v11 = vsel %vm523_vm7, %v429_v52, %v555_v3 }
 0x104   : > { %745 = vst.msk [vmem:[%s1108_s25 + $0x20] sm:$0xf] %vm736_vm1, %v910_v62  ;;  %761 = vst.msk [vmem:[%s1108_s25 + $0x60] sm:$0xf] %vm736_vm1, %v926_v2  ;;  %v603_v12 = vsel %vm539_vm8, %v493_v58, %v571_v4  ;;  %v434_v13 = vadd.f32 %v1096_v17, %v433_v59  ;;  %v498_v14 = vadd.f32 %v1096_v17, %v497_v60  ;;  %vm521_vm9 = vcmp.gt.f32.partialorder %v421_v6, 0.0 }
 0x105   : > { %v913_v15 = vpack.c.bf16 %v587_v11, %v587_v11  ;;  %v929_v16 = vpack.c.bf16 %v603_v12, %v603_v12  ;;  %v553_v18 = vmul.f32 0.2, %v421_v6  ;;  %vm537_vm10 = vcmp.gt.f32.partialorder %v485_v7, 0.0 }
 0x106   : > { %v569_v19 = vmul.f32 0.2, %v485_v7  ;;  %vm526_vm11 = vcmp.gt.f32.partialorder %v442_v8, 0.0  ;;  %v558_v20 = vmul.f32 0.2, %v442_v8  ;;  %vm542_vm12 = vcmp.gt.f32.partialorder %v506_v9, 0.0 }
 0x107   : > { %748 = vst.msk [vmem:[%s1108_s25 + $0x2c] sm:$0xf] %vm736_vm1, %v913_v15  ;;  %764 = vst.msk [vmem:[%s1108_s25 + $0x6c] sm:$0xf] %vm736_vm1, %v929_v16  ;;  %v585_v21 = vsel %vm521_vm9, %v421_v6, %v553_v18  ;;  %v574_v22 = vmul.f32 0.2, %v506_v9  ;;  %v445_v33 = vadd.f32 %v968_v0, %v1096_v17  ;;  %v509_v35 = vadd.f32 %v984_v1, %v1096_v17 }
 0x108   : > { %vm524_vm13 = vcmp.gt.f32.partialorder %v434_v13, 0.0  ;;  %v911_v23 = vpack.c.bf16 %v585_v21, %v585_v21  ;;  %v601_v24 = vsel %vm537_vm10, %v485_v7, %v569_v19  ;;  %v590_v25 = vsel %vm526_vm11, %v442_v8, %v558_v20 }
 0x109   : > { %v556_v26 = vmul.f32 0.2, %v434_v13  ;;  %v927_v27 = vpack.c.bf16 %v601_v24, %v601_v24  ;;  %v916_v28 = vpack.c.bf16 %v590_v25, %v590_v25  ;;  %v606_v29 = vsel %vm542_vm12, %v506_v9, %v574_v22 }
 0x10a   : > { %vm540_vm14 = vcmp.gt.f32.partialorder %v498_v14, 0.0  ;;  %746 = vst.msk [vmem:[%s1108_s25 + $0x24] sm:$0xf] %vm736_vm1, %v911_v23  ;;  %v932_v30 = vpack.c.bf16 %v606_v29, %v606_v29  ;;  %v572_v32 = vmul.f32 0.2, %v498_v14  ;;  %v437_v36 = vadd.f32 %v1096_v17, %v436_v5 }
 0x10b   : > { %v588_v31 = vsel %vm524_vm13, %v434_v13, %v556_v26  ;;  %762 = vst.msk [vmem:[%s1108_s25 + $0x64] sm:$0xf] %vm736_vm1, %v927_v27  ;;  %751 = vst.msk [vmem:[%s1108_s25 + $0x38] sm:$0xf] %vm736_vm1, %v916_v28  ;;  %v501_v37 = vadd.f32 %v1096_v17, %v500_v10  ;;  %vm527_vm15 = vcmp.gt.f32.partialorder %v445_v33, 0.0  ;;  %vm543_vm0 = vcmp.gt.f32.partialorder %v509_v35, 0.0 }
 0x10c   : > { %v914_v34 = vpack.c.bf16 %v588_v31, %v588_v31  ;;  %767 = vst.msk [vmem:[%s1108_s25 + $0x78] sm:$0xf] %vm736_vm1, %v932_v30  ;;  %v604_v38 = vsel %vm540_vm14, %v498_v14, %v572_v32  ;;  %v559_v39 = vmul.f32 0.2, %v445_v33  ;;  %v575_v41 = vmul.f32 0.2, %v509_v35 }
 0x10d   : > { %v930_v40 = vpack.c.bf16 %v604_v38, %v604_v38  ;;  %vm525_vm2 = vcmp.gt.f32.partialorder %v437_v36, 0.0  ;;  %v557_v43 = vmul.f32 0.2, %v437_v36  ;;  %vm541_vm3 = vcmp.gt.f32.partialorder %v501_v37, 0.0 }
 0x10e   : > { %749 = vst.msk [vmem:[%s1108_s25 + $0x30] sm:$0xf] %vm736_vm1, %v914_v34  ;;  %v591_v42 = vsel %vm527_vm15, %v445_v33, %v559_v39  ;;  %v573_v44 = vmul.f32 0.2, %v501_v37  ;;  %v607_v45 = vsel %vm543_vm0, %v509_v35, %v575_v41 }
 0x10f   : > { %765 = vst.msk [vmem:[%s1108_s25 + $0x70] sm:$0xf] %vm736_vm1, %v930_v40  ;;  %v917_v17 = vpack.c.bf16 %v591_v42, %v591_v42  ;;  %v933_v46 = vpack.c.bf16 %v607_v45, %v607_v45  ;;  %v589_v47 = vsel %vm525_vm2, %v437_v36, %v557_v43 }
 0x110   : > { %v605_v48 = vsel %vm541_vm3, %v501_v37, %v573_v44  ;;  %v915_v49 = vpack.c.bf16 %v589_v47, %v589_v47 }
 0x111   : > { %752 = vst.msk [vmem:[%s1108_s25 + $0x3c] sm:$0xf] %vm736_vm1, %v917_v17  ;;  %v931_v50 = vpack.c.bf16 %v605_v48, %v605_v48  ;;  %768 = vst.msk [vmem:[%s1108_s25 + $0x7c] sm:$0xf] %vm736_vm1, %v933_v46 }
 0x112   : > { %750 = vst.msk [vmem:[%s1108_s25 + $0x34] sm:$0xf] %vm736_vm1, %v915_v49 }
 0x113   : > { %766 = vst.msk [vmem:[%s1108_s25 + $0x74] sm:$0xf] %vm736_vm1, %v931_v50 }
 0x114 PF: > { %s13_s12 = sadd.s32 1, %s1018_s12  }
 0x115   : > { %p10_p4 = scmp.ge.s32.totalorder %s13_s12, 10  }
 0x117   :  { %12 = sbr.rel (!%p10_p4) target bundleno = 1 (0x1), region = 62 }

</bundles_post_ra>
